<compile_context>
chip_gen: v7x
topology: tpu7x:2x2x1
jax: 0.10.0
libtpu: 0.0.40
codegen_flags: <defaults>
</compile_context>

<pallas_src>
import jax
import jax.numpy as jnp
from jax.experimental import pallas as pl
from jax.experimental.pallas import tpu as pltpu

LANE = 128


# ----------------------------------------------------------------------------
# Fused Pallas kernel
# ----------------------------------------------------------------------------
def cherry_fused_kernel(
    xvT_ref, xhT_ref, avhT_ref, ahvT_ref,
    wnT_vh_ref, wrT_vh_ref, bvh_ref,
    wnT_hv_ref, wrT_hv_ref, bhv_ref,
    gv_ref, gh_ref,
    w1T_ref, b1_ref, w2_ref, b2_ref,
    o_ref,
):
    """Full CherryModel forward, transposed layout (nodes/edges on lanes).

    Encoder (per destination node type, one incoming edge type each):
        z_dst^T = ReLU( Wn^T (x_src^T A^T) + Wr^T x_dst^T + b )
    Decoder:
        z^T  = z_virus^T @ G_v - z_host^T @ G_h      (in-kernel one-hot gather)
        h1^T = ReLU(W1^T z^T + b1)
        out  = sum_over_features(h1^T * w2) + b2     (VPU mul + sublane reduce)
    """
    f32 = jnp.float32

    # --- encoder, destination = host ---
    aggT_h = jnp.dot(xvT_ref[...], avhT_ref[...], preferred_element_type=f32)
    z_hT = jnp.maximum(
        jnp.dot(wnT_vh_ref[...], aggT_h, preferred_element_type=f32)
        + jnp.dot(wrT_vh_ref[...], xhT_ref[...], preferred_element_type=f32)
        + bvh_ref[...],
        0.0)

    # --- encoder, destination = virus ---
    aggT_v = jnp.dot(xhT_ref[...], ahvT_ref[...], preferred_element_type=f32)
    z_vT = jnp.maximum(
        jnp.dot(wnT_hv_ref[...], aggT_v, preferred_element_type=f32)
        + jnp.dot(wrT_hv_ref[...], xvT_ref[...], preferred_element_type=f32)
        + bhv_ref[...],
        0.0)

    # --- decoder: in-kernel gather of endpoint embeddings (edges on lanes) ---
    virT = jnp.dot(z_vT, gv_ref[...], preferred_element_type=f32)    # [GNN, Epad]
    hostT = jnp.dot(z_hT, gh_ref[...], preferred_element_type=f32)   # [GNN, Epad]
    zT = virT - hostT
    h1T = jnp.maximum(
        jnp.dot(w1T_ref[...], zT, preferred_element_type=f32) + b1_ref[...],
        0.0)                                                          # [DEC, Epad]

    # Final Linear(., 1): VPU multiply + cross-sublane reduce -> lane-dense row.
    o_ref[...] = jnp.sum(h1T * w2_ref[...], axis=0, keepdims=True) + b2_ref[0]


def _vmem_specs(n):
    return [pl.BlockSpec(memory_space=pltpu.MemorySpace.VMEM) for _ in range(n)]


# ----------------------------------------------------------------------------
# Glue (graph preprocessing, parameter setup, end-to-end forward)
# ----------------------------------------------------------------------------
def _round_up(n, m=LANE):
    return ((n + m - 1) // m) * m


def _pad_to(x, shape):
    pads = [(0, t - s) for s, t in zip(x.shape, shape)]
    return jnp.pad(x, pads)


def dense_mean_adj(edge_index, n_dst, n_src):
    """Dense row-normalized adjacency: A[i, j] = 1/deg(i) per edge j->i."""
    src, dst = edge_index[0], edge_index[1]
    a = jnp.zeros((n_dst, n_src), jnp.float32).at[dst, src].add(1.0)
    deg = jnp.clip(jnp.sum(a, axis=1, keepdims=True), 1.0, None)
    return a / deg


def _one_hot_gather(idx, n_src_pad, n_edges_pad):
    """G[n_src_pad, n_edges_pad] with G[idx[e], e] = 1 (zero for padded edges)."""
    n_edges = idx.shape[0]
    g = jnp.zeros((n_src_pad, n_edges_pad), jnp.float32)
    return g.at[idx, jnp.arange(n_edges)].set(1.0)


def init_params(key, node_dim, gnn_hidden, dec_hidden):
    # Deterministic synthetic init (torch init not reproduced bit-exact).
    ks = jax.random.split(key, 8)
    s = 0.1

    def lin(k, din, dout):
        return s * jax.random.normal(k, (din, dout), jnp.float32)

    return {
        'vh': {  # edge type virus -> host
            'w_neigh': lin(ks[0], node_dim, gnn_hidden),
            'w_root': lin(ks[1], node_dim, gnn_hidden),
            'bias': s * jax.random.normal(ks[2], (1, gnn_hidden), jnp.float32),
        },
        'hv': {  # edge type host -> virus
            'w_neigh': lin(ks[3], node_dim, gnn_hidden),
            'w_root': lin(ks[4], node_dim, gnn_hidden),
            'bias': s * jax.random.normal(ks[5], (1, gnn_hidden), jnp.float32),
        },
        'dec': {
            'w1': lin(ks[6], gnn_hidden, dec_hidden),
            'b1': jnp.zeros((1, dec_hidden), jnp.float32),
            'w2': lin(ks[7], dec_hidden, 1),
            'b2': jnp.zeros((1, 1), jnp.float32),
        },
    }


def cherry_forward(params, x_dict, edge_index_dict, edge_label_index):
    xv, xh = x_dict['virus'], x_dict['host']
    nv, nh = xv.shape[0], xh.shape[0]
    node_dim = xv.shape[1]
    nl = edge_label_index.shape[1]
    nvp, nhp, nlp = _round_up(nv), _round_up(nh), _round_up(nl)

    # Dense normalized adjacencies (built once in glue).
    a_vh = dense_mean_adj(edge_index_dict[('virus', 'infects', 'host')], nh, nv)
    a_hv = dense_mean_adj(edge_index_dict[('host', 'rev_infects', 'virus')], nv, nh)

    # Transposed, lane-padded operands: nodes / edges sit on the 128-lane axis.
    xvT = _pad_to(xv.T, (node_dim, nvp))           # [D, NVp]
    xhT = _pad_to(xh.T, (node_dim, nhp))           # [D, NHp]
    avhT = _pad_to(a_vh.T, (nvp, nhp))             # A_vh^T : [NVp, NHp]
    ahvT = _pad_to(a_hv.T, (nhp, nvp))             # A_hv^T : [NHp, NVp]

    # One-hot gather matrices for the label edges (zero rows for padded nodes
    # and zero columns for padded edges, so padding never leaks into scores).
    row, col = edge_label_index[0], edge_label_index[1]
    gv = _one_hot_gather(row, nvp, nlp)            # [NVp, NLp]
    gh = _one_hot_gather(col, nhp, nlp)            # [NHp, NLp]

    # Weights in transposed orientation; biases as columns (broadcast on lanes).
    wnT_vh = params['vh']['w_neigh'].T
    wrT_vh = params['vh']['w_root'].T
    bvh = params['vh']['bias'].T                   # [GNN, 1]
    wnT_hv = params['hv']['w_neigh'].T
    wrT_hv = params['hv']['w_root'].T
    bhv = params['hv']['bias'].T                   # [GNN, 1]
    w1T = params['dec']['w1'].T                    # [DEC, GNN]
    b1 = params['dec']['b1'].T                     # [DEC, 1]
    w2 = params['dec']['w2']                       # [DEC, 1]
    b2 = params['dec']['b2'].reshape(1)            # scalar -> SMEM

    out = pl.pallas_call(
        cherry_fused_kernel,
        out_shape=jax.ShapeDtypeStruct((1, nlp), jnp.float32),
        in_specs=_vmem_specs(15)
        + [pl.BlockSpec(memory_space=pltpu.MemorySpace.SMEM)],   # b2 scalar
        out_specs=pl.BlockSpec(memory_space=pltpu.MemorySpace.VMEM),
    )(xvT, xhT, avhT, ahvT,
      wnT_vh, wrT_vh, bvh,
      wnT_hv, wrT_hv, bhv,
      gv, gh,
      w1T, b1, w2, b2)

    # TODO(synk): for non-toy graphs, grid/tile the A_norm matmul (dst rows
    # "parallel", src/reduction axis "arbitrary", VMEM accumulator + pl.when
    # init/finalize, vmem_limit sized for v7x's 64 MiB) or switch to a CSR +
    # scalar-prefetch gather path instead of a dense adjacency.
    return out[0, :nl]


# Pure-JAX reference for a correctness check.
def cherry_forward_ref(params, x_dict, edge_index_dict, edge_label_index):
    nv = x_dict['virus'].shape[0]
    nh = x_dict['host'].shape[0]
    a_vh = dense_mean_adj(edge_index_dict[('virus', 'infects', 'host')], nh, nv)
    a_hv = dense_mean_adj(edge_index_dict[('host', 'rev_infects', 'virus')], nv, nh)
    z_host = jnp.maximum(
        a_vh @ x_dict['virus'] @ params['vh']['w_neigh']
        + x_dict['host'] @ params['vh']['w_root'] + params['vh']['bias'], 0.0)
    z_virus = jnp.maximum(
        a_hv @ x_dict['host'] @ params['hv']['w_neigh']
        + x_dict['virus'] @ params['hv']['w_root'] + params['hv']['bias'], 0.0)
    row, col = edge_label_index[0], edge_label_index[1]
    z = z_virus[row] - z_host[col]
    h1 = jnp.maximum(z @ params['dec']['w1'] + params['dec']['b1'], 0.0)
    return jnp.squeeze(h1 @ params['dec']['w2'] + params['dec']['b2'], axis=-1)


if __name__ == "__main__":
    key = jax.random.PRNGKey(0)
    k_xv, k_xh, k_evh, k_ehv, k_lbl, k_par = jax.random.split(key, 6)

    # Small synthetic hetero graph.
    NODE_DIM = 16       # data['virus'].x.size(1)
    GNN_HIDDEN = 32     # gnn_hidden_dims
    DEC_HIDDEN = 16     # linear_hidden_dims = (16,)
    NV, NH = 16, 16     # number of virus / host nodes
    NE = 32             # edges per edge type
    NL = 8              # label edges to score

    x_dict = {
        'virus': jax.random.normal(k_xv, (NV, NODE_DIM), jnp.float32),
        'host': jax.random.normal(k_xh, (NH, NODE_DIM), jnp.float32),
    }
    edge_index_dict = {
        ('virus', 'infects', 'host'): jnp.stack([
            jax.random.randint(k_evh, (NE,), 0, NV),
            jax.random.randint(jax.random.fold_in(k_evh, 1), (NE,), 0, NH)]),
        ('host', 'rev_infects', 'virus'): jnp.stack([
            jax.random.randint(k_ehv, (NE,), 0, NH),
            jax.random.randint(jax.random.fold_in(k_ehv, 1), (NE,), 0, NV)]),
    }
    edge_label_index = jnp.stack([
        jax.random.randint(k_lbl, (NL,), 0, NV),
        jax.random.randint(jax.random.fold_in(k_lbl, 1), (NL,), 0, NH)])

    params = init_params(k_par, NODE_DIM, GNN_HIDDEN, DEC_HIDDEN)

    out = cherry_forward(params, x_dict, edge_index_dict, edge_label_index)
    out = jax.block_until_ready(out)

    ref = cherry_forward_ref(params, x_dict, edge_index_dict, edge_label_index)
    assert out.shape == (NL,), out.shape
    assert jnp.allclose(out, ref, atol=1e-4, rtol=1e-4), (out, ref)

    # TODO(synk): dropout omitted (eval mode); sparse scatter message passing
    # realized as a dense normalized-adjacency matmul (CSR path left as TODO).
    print("KERNEL_OK")
</pallas_src>

<mosaic_0001>
module attributes {stable_mosaic.version = 11 : i64} {
  func.func @cherry_fused_kernel(%arg0: memref<16x128xf32, #tpu.memory_space<vmem>>, %arg1: memref<16x128xf32, #tpu.memory_space<vmem>>, %arg2: memref<128x128xf32, #tpu.memory_space<vmem>>, %arg3: memref<128x128xf32, #tpu.memory_space<vmem>>, %arg4: memref<32x16xf32, #tpu.memory_space<vmem>>, %arg5: memref<32x16xf32, #tpu.memory_space<vmem>>, %arg6: memref<32x1xf32, #tpu.memory_space<vmem>>, %arg7: memref<32x16xf32, #tpu.memory_space<vmem>>, %arg8: memref<32x16xf32, #tpu.memory_space<vmem>>, %arg9: memref<32x1xf32, #tpu.memory_space<vmem>>, %arg10: memref<128x128xf32, #tpu.memory_space<vmem>>, %arg11: memref<128x128xf32, #tpu.memory_space<vmem>>, %arg12: memref<16x32xf32, #tpu.memory_space<vmem>>, %arg13: memref<16x1xf32, #tpu.memory_space<vmem>>, %arg14: memref<16x1xf32, #tpu.memory_space<vmem>>, %arg15: memref<1xf32, #tpu.memory_space<smem>>, %arg16: memref<1x128xf32, #tpu.memory_space<vmem>>) attributes {dimension_semantics = [], scalar_prefetch = 0 : i64, scratch_operands = 0 : i64, tpu.core_type = #tpu.core_type<tc>} {
    %c0 = arith.constant 0 : index
    %c0_0 = arith.constant 0 : index
    %0 = vector.load %arg0[%c0, %c0_0] : memref<16x128xf32, #tpu.memory_space<vmem>>, vector<16x128xf32>
    %c0_1 = arith.constant 0 : index
    %c0_2 = arith.constant 0 : index
    %1 = vector.load %arg2[%c0_1, %c0_2] : memref<128x128xf32, #tpu.memory_space<vmem>>, vector<128x128xf32>
    %cst = arith.constant dense<0.000000e+00> : vector<16x128xf32>
    %2 = tpu.matmul %0, %1, %cst {dimension_numbers = #tpu.dot_dimension_numbers<[1], [0], [0], [1], [0, 0, 1, 1], [], []>} : vector<16x128xf32>, vector<128x128xf32>, vector<16x128xf32> -> vector<16x128xf32>
    %c0_3 = arith.constant 0 : index
    %c0_4 = arith.constant 0 : index
    %3 = vector.load %arg4[%c0_3, %c0_4] : memref<32x16xf32, #tpu.memory_space<vmem>>, vector<32x16xf32>
    %cst_5 = arith.constant dense<0.000000e+00> : vector<32x128xf32>
    %4 = tpu.matmul %3, %2, %cst_5 {dimension_numbers = #tpu.dot_dimension_numbers<[1], [0], [0], [1], [0, 0, 1, 1], [], []>} : vector<32x16xf32>, vector<16x128xf32>, vector<32x128xf32> -> vector<32x128xf32>
    %c0_6 = arith.constant 0 : index
    %c0_7 = arith.constant 0 : index
    %5 = vector.load %arg5[%c0_6, %c0_7] : memref<32x16xf32, #tpu.memory_space<vmem>>, vector<32x16xf32>
    %c0_8 = arith.constant 0 : index
    %c0_9 = arith.constant 0 : index
    %6 = vector.load %arg1[%c0_8, %c0_9] : memref<16x128xf32, #tpu.memory_space<vmem>>, vector<16x128xf32>
    %cst_10 = arith.constant dense<0.000000e+00> : vector<32x128xf32>
    %7 = tpu.matmul %5, %6, %cst_10 {dimension_numbers = #tpu.dot_dimension_numbers<[1], [0], [0], [1], [0, 0, 1, 1], [], []>} : vector<32x16xf32>, vector<16x128xf32>, vector<32x128xf32> -> vector<32x128xf32>
    %8 = arith.addf %4, %7 : vector<32x128xf32>
    %c0_11 = arith.constant 0 : index
    %c0_12 = arith.constant 0 : index
    %9 = vector.load %arg6[%c0_11, %c0_12] : memref<32x1xf32, #tpu.memory_space<vmem>>, vector<32x1xf32>
    %10 = vector.broadcast %9 : vector<32x1xf32> to vector<32x128xf32>
    %11 = arith.addf %8, %10 : vector<32x128xf32>
    %cst_13 = arith.constant 0.000000e+00 : f32
    %12 = vector.broadcast %cst_13 : f32 to vector<32x128xf32>
    %13 = arith.maximumf %11, %12 : vector<32x128xf32>
    %c0_14 = arith.constant 0 : index
    %c0_15 = arith.constant 0 : index
    %14 = vector.load %arg1[%c0_14, %c0_15] : memref<16x128xf32, #tpu.memory_space<vmem>>, vector<16x128xf32>
    %c0_16 = arith.constant 0 : index
    %c0_17 = arith.constant 0 : index
    %15 = vector.load %arg3[%c0_16, %c0_17] : memref<128x128xf32, #tpu.memory_space<vmem>>, vector<128x128xf32>
    %cst_18 = arith.constant dense<0.000000e+00> : vector<16x128xf32>
    %16 = tpu.matmul %14, %15, %cst_18 {dimension_numbers = #tpu.dot_dimension_numbers<[1], [0], [0], [1], [0, 0, 1, 1], [], []>} : vector<16x128xf32>, vector<128x128xf32>, vector<16x128xf32> -> vector<16x128xf32>
    %c0_19 = arith.constant 0 : index
    %c0_20 = arith.constant 0 : index
    %17 = vector.load %arg7[%c0_19, %c0_20] : memref<32x16xf32, #tpu.memory_space<vmem>>, vector<32x16xf32>
    %cst_21 = arith.constant dense<0.000000e+00> : vector<32x128xf32>
    %18 = tpu.matmul %17, %16, %cst_21 {dimension_numbers = #tpu.dot_dimension_numbers<[1], [0], [0], [1], [0, 0, 1, 1], [], []>} : vector<32x16xf32>, vector<16x128xf32>, vector<32x128xf32> -> vector<32x128xf32>
    %c0_22 = arith.constant 0 : index
    %c0_23 = arith.constant 0 : index
    %19 = vector.load %arg8[%c0_22, %c0_23] : memref<32x16xf32, #tpu.memory_space<vmem>>, vector<32x16xf32>
    %c0_24 = arith.constant 0 : index
    %c0_25 = arith.constant 0 : index
    %20 = vector.load %arg0[%c0_24, %c0_25] : memref<16x128xf32, #tpu.memory_space<vmem>>, vector<16x128xf32>
    %cst_26 = arith.constant dense<0.000000e+00> : vector<32x128xf32>
    %21 = tpu.matmul %19, %20, %cst_26 {dimension_numbers = #tpu.dot_dimension_numbers<[1], [0], [0], [1], [0, 0, 1, 1], [], []>} : vector<32x16xf32>, vector<16x128xf32>, vector<32x128xf32> -> vector<32x128xf32>
    %22 = arith.addf %18, %21 : vector<32x128xf32>
    %c0_27 = arith.constant 0 : index
    %c0_28 = arith.constant 0 : index
    %23 = vector.load %arg9[%c0_27, %c0_28] : memref<32x1xf32, #tpu.memory_space<vmem>>, vector<32x1xf32>
    %24 = vector.broadcast %23 : vector<32x1xf32> to vector<32x128xf32>
    %25 = arith.addf %22, %24 : vector<32x128xf32>
    %cst_29 = arith.constant 0.000000e+00 : f32
    %26 = vector.broadcast %cst_29 : f32 to vector<32x128xf32>
    %27 = arith.maximumf %25, %26 : vector<32x128xf32>
    %c0_30 = arith.constant 0 : index
    %c0_31 = arith.constant 0 : index
    %28 = vector.load %arg10[%c0_30, %c0_31] : memref<128x128xf32, #tpu.memory_space<vmem>>, vector<128x128xf32>
    %cst_32 = arith.constant dense<0.000000e+00> : vector<32x128xf32>
    %29 = tpu.matmul %27, %28, %cst_32 {dimension_numbers = #tpu.dot_dimension_numbers<[1], [0], [0], [1], [0, 0, 1, 1], [], []>} : vector<32x128xf32>, vector<128x128xf32>, vector<32x128xf32> -> vector<32x128xf32>
    %c0_33 = arith.constant 0 : index
    %c0_34 = arith.constant 0 : index
    %30 = vector.load %arg11[%c0_33, %c0_34] : memref<128x128xf32, #tpu.memory_space<vmem>>, vector<128x128xf32>
    %cst_35 = arith.constant dense<0.000000e+00> : vector<32x128xf32>
    %31 = tpu.matmul %13, %30, %cst_35 {dimension_numbers = #tpu.dot_dimension_numbers<[1], [0], [0], [1], [0, 0, 1, 1], [], []>} : vector<32x128xf32>, vector<128x128xf32>, vector<32x128xf32> -> vector<32x128xf32>
    %32 = arith.subf %29, %31 : vector<32x128xf32>
    %c0_36 = arith.constant 0 : index
    %c0_37 = arith.constant 0 : index
    %33 = vector.load %arg12[%c0_36, %c0_37] : memref<16x32xf32, #tpu.memory_space<vmem>>, vector<16x32xf32>
    %cst_38 = arith.constant dense<0.000000e+00> : vector<16x128xf32>
    %34 = tpu.matmul %33, %32, %cst_38 {dimension_numbers = #tpu.dot_dimension_numbers<[1], [0], [0], [1], [0, 0, 1, 1], [], []>} : vector<16x32xf32>, vector<32x128xf32>, vector<16x128xf32> -> vector<16x128xf32>
    %c0_39 = arith.constant 0 : index
    %c0_40 = arith.constant 0 : index
    %35 = vector.load %arg13[%c0_39, %c0_40] : memref<16x1xf32, #tpu.memory_space<vmem>>, vector<16x1xf32>
    %36 = vector.broadcast %35 : vector<16x1xf32> to vector<16x128xf32>
    %37 = arith.addf %34, %36 : vector<16x128xf32>
    %cst_41 = arith.constant 0.000000e+00 : f32
    %38 = vector.broadcast %cst_41 : f32 to vector<16x128xf32>
    %39 = arith.maximumf %37, %38 : vector<16x128xf32>
    %c0_42 = arith.constant 0 : index
    %c0_43 = arith.constant 0 : index
    %40 = vector.load %arg14[%c0_42, %c0_43] : memref<16x1xf32, #tpu.memory_space<vmem>>, vector<16x1xf32>
    %41 = vector.broadcast %40 : vector<16x1xf32> to vector<16x128xf32>
    %42 = arith.mulf %39, %41 : vector<16x128xf32>
    %cst_44 = arith.constant dense<0.000000e+00> : vector<128xf32>
    %43 = vector.multi_reduction <add>, %42, %cst_44 [0] : vector<16x128xf32> to vector<128xf32>
    %44 = vector.shape_cast %43 : vector<128xf32> to vector<1x128xf32>
    %c0_45 = arith.constant 0 : index
    %45 = memref.load %arg15[%c0_45] : memref<1xf32, #tpu.memory_space<smem>>
    %46 = vector.broadcast %45 : f32 to vector<1x128xf32>
    %47 = arith.addf %44, %46 : vector<1x128xf32>
    %c0_46 = arith.constant 0 : index
    %c0_47 = arith.constant 0 : index
    %48 = vector.load %arg16[%c0_46, %c0_47] : memref<1x128xf32, #tpu.memory_space<vmem>>, vector<1x128xf32>
    tpu.vector_store %arg16[%c0_46, %c0_47], %47 {strides = array<i32>} : memref<1x128xf32, #tpu.memory_space<vmem>>, vector<1x128xf32>,
    return
  }
}

</mosaic_0001>

<bundles_post_ra>
// kernel: tpu_custom_call.1
= control target key start
LH: loop header
LB: loop body
LE: loop exit
PB: predicated region body
PF: predicated region fallthrough
CT: control target
= control target key end

     0   :  { %s2117_s0 = inlined_call_operand.hbm [shape: f32[16,128], index: 0, kind: input, shape index: {}]   ;;  %s2118_s1 = inlined_call_operand.hbm [shape: f32[16,128], index: 1, kind: input, shape index: {}]   ;;  %s2119_s2 = inlined_call_operand.vmem [shape: f32[128,128], index: 2, kind: input, shape index: {}]   ;;  %s2120_s3 = inlined_call_operand.vmem [shape: f32[128,128], index: 3, kind: input, shape index: {}]   ;;  %s2121_s4 = inlined_call_operand.vmem [shape: f32[32,16], index: 4, kind: input, shape index: {}]   ;;  %s2122_s5 = inlined_call_operand.vmem [shape: f32[32,16], index: 5, kind: input, shape index: {}]   ;;  %s2123_s6 = inlined_call_operand.vmem [shape: f32[32,1], index: 6, kind: input, shape index: {}]   ;;  %s2124_s7 = inlined_call_operand.vmem [shape: f32[32,16], index: 7, kind: input, shape index: {}]   ;;  %s2125_s8 = inlined_call_operand.vmem [shape: f32[32,16], index: 8, kind: input, shape index: {}]   ;;  %s2126_s9 = inlined_call_operand.vmem [shape: f32[32,1], index: 9, kind: input, shape index: {}]   ;;  %s2127_s10 = inlined_call_operand.hbm [shape: f32[128,128], index: 10, kind: input, shape index: {}]   ;;  %s2128_s11 = inlined_call_operand.hbm [shape: f32[128,128], index: 11, kind: input, shape index: {}]   ;;  %s2129_s12 = inlined_call_operand.vmem [shape: f32[16,32], index: 12, kind: input, shape index: {}]   ;;  %s2130_s13 = inlined_call_operand.vmem [shape: f32[16,1], index: 13, kind: input, shape index: {}]   ;;  %s2131_s14 = inlined_call_operand.vmem [shape: f32[16,1], index: 14, kind: input, shape index: {}]   ;;  %s2132_s15 = inlined_call_operand.<no memory space> [shape: f32[1], index: 15, kind: input, shape index: {}]   ;;  %s2133_s16 = inlined_call_operand.hbm [shape: f32[1,128], index: 16, kind: output, shape index: {}]  }
   0x1   :  { %2136 = sst [smem:[#allocation16_spill]] %s2117_s0 }
   0x2   :  { %2137 = sst [smem:[#allocation17_spill]] %s2133_s16 }
   0x3   :  { %22 = vsyncpa [#allocation4], 0 }
   0x4   :  { %23 = vsyncpa [#allocation7], 0 }
   0x5   :  { %24 = vsyncpa [#allocation10], 0 }
   0x6   :  { %25 = vsyncpa [#allocation5], 0  ;;  %s1720_s21 = smov [#allocation6]   ;;  %s1721_s23 = smov [#allocation3]  }
   0x7   :  { %s43_s22 = sshll.u32 %s1720_s21, 4  ;;  %s31_s24 = sshll.u32 %s1721_s23, 4  ;;  %s44_s22 = int_to_ptr.vmem [resolvable:$true] %s43_s22  ;;  %s1813_s24 = int_to_ptr.vmem [resolvable:$true] %s31_s24 }
   0x8   :  { %s1602_s27 = scalar_lea.hbm %s2118_s1, 256 }
   0x9   :  { %p1603_p0 = scmp.ne.s32.totalorder %s2118_s1, %s1602_s27  ;;  %p1606_p1 = scmp.lt.u32.totalorder %s1602_s27, %s2118_s1 }
   0xb   :  { %p1608_p2 = pnand %p1606_p1, %p1603_p0 }
   0xd   :  { %1611 = shalt.err (!%p1608_p2)
}
   0xe   :  { %s1612_s17 = scalar_lea.vmem %s44_s22, 256  ;;  %p1617_p4 = scmp.lt.s32.totalorder %s44_s22, %s44_s22 }
   0xf   :  { %p1613_p3 = scmp.ne.s32.totalorder %s44_s22, %s1612_s17  ;;  %p1618_p5 = scmp.lt.s32.totalorder %s1612_s17, %s1612_s17 }
  0x11   :  { %p1619_p6 = por %p1618_p5, %p1617_p4 }
  0x13   :  { %p1620_p7 = pnand %p1619_p6, %p1613_p3 }
  0x15   :  { %1623 = shalt.err (!%p1620_p7)
}
  0x16   :  { %s1722_s18 = smov 128   ;;  %s1723_s19 = smov 8  }
  0x17   :  { %49 = dma.hbm_to_vmem [thread:$0]  %s2118_s1, 256, %s44_s22, [#allocation7], %s1722_s18, %s1722_s18, %s1723_s19  }
  0x18   :  { %s2138_s26 = sld [smem:[#allocation16_spill]] }
  0x1e   :  { %s1624_s27 = scalar_lea.hbm %s2138_s26, 256 }
  0x1f   :  { %p1625_p8 = scmp.ne.s32.totalorder %s2138_s26, %s1624_s27  ;;  %p1628_p9 = scmp.lt.u32.totalorder %s1624_s27, %s2138_s26 }
  0x21   :  { %p1630_p10 = pnand %p1628_p9, %p1625_p8 }
  0x23   :  { %1633 = shalt.err (!%p1630_p10)
}
  0x24   :  { %s1634_s17 = scalar_lea.vmem %s1813_s24, 256  ;;  %p1639_p12 = scmp.lt.s32.totalorder %s1813_s24, %s1813_s24 }
  0x25   :  { %p1635_p11 = scmp.ne.s32.totalorder %s1813_s24, %s1634_s17  ;;  %p1640_p13 = scmp.lt.s32.totalorder %s1634_s17, %s1634_s17 }
  0x27   :  { %p1641_p0 = por %p1640_p13, %p1639_p12 }
  0x29   :  { %p1642_p1 = pnand %p1641_p0, %p1635_p11 }
  0x2b   :  { %1645 = shalt.err (!%p1642_p1)
}
  0x2c   :  { %37 = dma.hbm_to_vmem [thread:$0]  %s2138_s26, 256, %s1813_s24, [#allocation4], %s1722_s18, %s1722_s18, %s1723_s19  }
  0x2d   :  { %s1724_s20 = smov [#allocation8]   ;;  %s1725_s23 = smov [#allocation9]  }
  0x2e   :  { %s71_s21 = sshll.u32 %s1724_s20, 4  ;;  %s83_s25 = sshll.u32 %s1725_s23, 4  ;;  %s72_s21 = int_to_ptr.vmem [resolvable:$true] %s71_s21  ;;  %s1850_s25 = int_to_ptr.vmem [resolvable:$true] %s83_s25 }
  0x2f   :  { %s1646_s29 = scalar_lea.hbm %s2127_s10, 2048 }
  0x30   :  { %p1647_p2 = scmp.ne.s32.totalorder %s2127_s10, %s1646_s29  ;;  %p1650_p3 = scmp.lt.u32.totalorder %s1646_s29, %s2127_s10 }
  0x32   :  { %p1652_p4 = pnand %p1650_p3, %p1647_p2 }
  0x34   :  { %1655 = shalt.err (!%p1652_p4)
}
  0x35   :  { %s1656_s24 = scalar_lea.vmem %s72_s21, 2048  ;;  %p1661_p6 = scmp.lt.s32.totalorder %s72_s21, %s72_s21 }
  0x36   :  { %p1657_p5 = scmp.ne.s32.totalorder %s72_s21, %s1656_s24  ;;  %p1662_p7 = scmp.lt.s32.totalorder %s1656_s24, %s1656_s24 }
  0x38   :  { %p1663_p8 = por %p1662_p7, %p1661_p6 }
  0x3a   :  { %p1664_p9 = pnand %p1663_p8, %p1657_p5 }
  0x3c   :  { %1667 = shalt.err (!%p1664_p9)
}
  0x3d   :  { %77 = dma.hbm_to_vmem [thread:$0]  %s2127_s10, 2048, %s72_s21, [#allocation7], %s1722_s18, %s1722_s18, %s1723_s19  }
  0x3e   :  { %s1668_s16 = scalar_lea.hbm %s2128_s11, 2048 }
  0x3f   :  { %p1669_p10 = scmp.ne.s32.totalorder %s2128_s11, %s1668_s16  ;;  %p1672_p11 = scmp.lt.u32.totalorder %s1668_s16, %s2128_s11 }
  0x41   :  { %p1674_p12 = pnand %p1672_p11, %p1669_p10 }
  0x43   :  { %1677 = shalt.err (!%p1674_p12)
}
  0x44   :  { %s1678_s30 = scalar_lea.vmem %s1850_s25, 2048  ;;  %p1683_p0 = scmp.lt.s32.totalorder %s1850_s25, %s1850_s25 }
  0x45   :  { %p1679_p13 = scmp.ne.s32.totalorder %s1850_s25, %s1678_s30  ;;  %p1684_p1 = scmp.lt.s32.totalorder %s1678_s30, %s1678_s30 }
  0x47   :  { %p1685_p2 = por %p1684_p1, %p1683_p0 }
  0x49   :  { %p1686_p3 = pnand %p1685_p2, %p1679_p13 }
  0x4b   :  { %1689 = shalt.err (!%p1686_p3)
}
  0x4c   :  { %89 = dma.hbm_to_vmem [thread:$0]  %s2128_s11, 2048, %s1850_s25, [#allocation10], %s1722_s18, %s1722_s18, %s1723_s19  }
  0x4d   :  { %1712 = dma.done.wait [#allocation4], 256  }
  0x4e   :  { %1713 = vsyncadd [#allocation4], 4294967040 }
  0x4f   :  { %1714 = dma.done.wait [#allocation7], 2304  }
  0x50   :  { %1715 = vsyncadd [#allocation7], 4294964992 }
  0x51   :  { %1716 = dma.done.wait [#allocation10], 2048  }
  0x52   :  { %1717 = vsyncadd [#allocation10], 4294965248  ;;  %v112_v0 = vld [vmem:[%s2119_s2] sm:$0xff]  ;;  %v113_v1 = vld [vmem:[%s2119_s2 + $0x8] sm:$0xff]  ;;  %vm213_vm0 = vcmask 130048   ;;  %v1726_v37 = vmov 0  }
  0x53   :  { %v114_v2 = vld [vmem:[%s2119_s2 + $0x10] sm:$0xff]  ;;  %v1432_v3 = vpack.c.bf16 %v113_v1, %v112_v0  ;;  %v115_v4 = vld [vmem:[%s2119_s2 + $0x18] sm:$0xff]  ;;  %v116_v6 = vld [vmem:[%s2119_s2 + $0x20] sm:$0xff]  ;;  %1600 = vset.pattern.permute.xlu0 %v1726_v37  ;;  %1601 = vset.pattern.permute.xlu1 %v1726_v37  ;;  %vm985_vm1 = vcmask 261120   ;;  %s1727_s20 = smov [#allocation11]  }
  0x54   :  { %v1436_v5 = vpack.c.bf16 %v115_v4, %v114_v2  ;;  %v117_v7 = vld [vmem:[%s2119_s2 + $0x28] sm:$0xff]  ;;  %v118_v9 = vld [vmem:[%s2119_s2 + $0x30] sm:$0xff]  ;;  %v119_v10 = vld [vmem:[%s2119_s2 + $0x38] sm:$0xff]  ;;  %s1100_s16 = sshll.u32 %s1727_s20, 4  ;;  %s1101_s16 = int_to_ptr.vmem [resolvable:$true] %s1100_s16 }
  0x55   :  { %1433 = vmatprep.subr.bf16.mxu0 %v1432_v3  ;;  %v1440_v8 = vpack.c.bf16 %v117_v7, %v116_v6  ;;  %v110_v11 = vld [vmem:[#allocation3] sm:$0xff]  ;;  %v1911_v12 = vld [vmem:[#allocation6] sm:$0xff]  ;;  %v1913_v13 = vld [vmem:[#allocation6 + $0x8] sm:$0xff]  ;;  %v1444_v16 = vpack.c.bf16 %v119_v10, %v118_v9  ;;  %s1690_s23 = scalar_lea.vmem %s1101_s16, 16  ;;  %s1694_s27 = scalar_lea.vmem %s1101_s16, 32 }
  0x56   :  { %1435 = vmatpush3.bf16.msra.mxu0 %v1432_v3  ;;  %1267 = vmatprep.mubr.f32.mxu0 %v110_v11  ;;  %v207_v14 = vld [vmem:[%s2122_s5] sm:$0xff]  ;;  %v1464_v15 = vpack.c.bf16 %v1913_v13, %v1911_v12  ;;  %v121_v18 = vld [vmem:[%s2119_s2 + $0x48] sm:$0xff]  ;;  %v122_v20 = vld [vmem:[%s2119_s2 + $0x50] sm:$0xff]  ;;  %p1691_p4 = scmp.ne.s32.totalorder %s1101_s16, %s1690_s23  ;;  %p1695_p5 = scmp.lt.s32.totalorder %s1101_s16, %s1101_s16 }
  0x57   :  { %1437 = vmatprep.subr.bf16.mxu0 %v1436_v5  ;;  %1274 = vmatprep.mubr.msk.f32.mxu1 %vm213_vm0, %v207_v14  ;;  %v120_v17 = vld [vmem:[%s2119_s2 + $0x40] sm:$0xff]  ;;  %v123_v21 = vld [vmem:[%s2119_s2 + $0x58] sm:$0xff]  ;;  %v125_v24 = vld [vmem:[%s2119_s2 + $0x68] sm:$0xff]  ;;  %p1696_p6 = scmp.lt.s32.totalorder %s1694_s27, %s1690_s23 }
  0x58   :  { %1465 = vmatprep.subr.bf16.mxu1 %v1464_v15  ;;  %v1448_v19 = vpack.c.bf16 %v121_v18, %v120_v17  ;;  %v1452_v22 = vpack.c.bf16 %v123_v21, %v122_v20  ;;  %v124_v23 = vld [vmem:[%s2119_s2 + $0x60] sm:$0xff]  ;;  %v126_v26 = vld [vmem:[%s2119_s2 + $0x70] sm:$0xff]  ;;  %v127_v27 = vld [vmem:[%s2119_s2 + $0x78] sm:$0xff] }
  0x59   :  { %1467 = vmatpush3.bf16.msra.mxu1 %v1464_v15  ;;  %v1456_v25 = vpack.c.bf16 %v125_v24, %v124_v23  ;;  %v1460_v28 = vpack.c.bf16 %v127_v27, %v126_v26  ;;  %v111_v29 = vld [vmem:[#allocation3 + $0x8] sm:$0xff]  ;;  %v209_v32 = vld [vmem:[%s2122_s5 + $0x10] sm:$0xff]  ;;  %v210_v33 = vld [vmem:[%s2122_s5 + $0x18] sm:$0xff]  ;;  %p1697_p7 = por %p1696_p6, %p1695_p5 }
  0x5a   :  { %1439 = vmatpush3.bf16.msra.mxu0 %v1436_v5  ;;  %v1504_v30 = vpack.c.bf16 %v111_v29, %v110_v11  ;;  %v208_v31 = vld [vmem:[%s2122_s5 + $0x8] sm:$0xff]  ;;  %v203_v34 = vld [vmem:[%s2121_s4] sm:$0xff]  ;;  %v410_v39 = vld [vmem:[%s2123_s6 + $0x10] sm:$0xff] }
  0x5b   :  { %1441 = vmatprep.subr.bf16.mxu0 %v1440_v8  ;;  %v408_v35 = vld [vmem:[%s2123_s6] sm:$0xff]  ;;  %v409_v36 = vld [vmem:[%s2123_s6 + $0x8] sm:$0xff]  ;;  %v411_v40 = vld [vmem:[%s2123_s6 + $0x18] sm:$0xff]  ;;  %p1698_p8 = pnand %p1697_p7, %p1691_p4 }
  0x5c   :  { %1275 = vmatmul.mubr.msk.f32.vlgmr.msra.gmra.mrb[0].mxu1 %vm213_vm0, %v208_v31  ;;  %414 = vperm.xlu0 %1600, %v408_v35   ;;  %v733_v38 = vld [vmem:[%s2126_s9] sm:$0xff]  ;;  %v441_v42 = vld [vmem:[%s2120_s3 + $0x8] sm:$0xff]  ;;  %v442_v47 = vld [vmem:[%s2120_s3 + $0x10] sm:$0xff] }
  0x5d   :  { %1277 = vmatprep.mubr.msk.f32.mxu1 %vm213_vm0, %v209_v32  ;;  %419 = vperm.xlu1 %1601, %v409_v36   ;;  %v440_v41 = vld [vmem:[%s2120_s3] sm:$0xff]  ;;  %v443_v48 = vld [vmem:[%s2120_s3 + $0x18] sm:$0xff]  ;;  %v204_v49 = vld [vmem:[%s2121_s4 + $0x8] sm:$0xff] }
  0x5e   :  { %1443 = vmatpush3.bf16.msra.mxu0 %v1440_v8  ;;  %v1472_v46 = vpack.c.bf16 %v441_v42, %v440_v41  ;;  %v205_v50 = vld [vmem:[%s2121_s4 + $0x10] sm:$0xff]  ;;  %v1476_v51 = vpack.c.bf16 %v443_v48, %v442_v47  ;;  %v444_v52 = vld [vmem:[%s2120_s3 + $0x20] sm:$0xff]  ;;  %v445_v53 = vld [vmem:[%s2120_s3 + $0x28] sm:$0xff] }
  0x5f   :  { %1445 = vmatprep.subr.bf16.mxu0 %v1444_v16  ;;  %v206_v54 = vld [vmem:[%s2121_s4 + $0x18] sm:$0xff]  ;;  %v1480_v55 = vpack.c.bf16 %v445_v53, %v444_v52  ;;  %v446_v56 = vld [vmem:[%s2120_s3 + $0x30] sm:$0xff]  ;;  %v448_v59 = vld [vmem:[%s2120_s3 + $0x40] sm:$0xff] }
  0x60   :  { %1278 = vmatmul.mubr.msk.f32.gmra.mrb[2].mxu1 %vm213_vm0, %v210_v33  ;;  %739 = vperm.xlu0 %1600, %v733_v38   ;;  %v447_v57 = vld [vmem:[%s2120_s3 + $0x38] sm:$0xff]  ;;  %v449_v60 = vld [vmem:[%s2120_s3 + $0x48] sm:$0xff]  ;;  %v450_v62 = vld [vmem:[%s2120_s3 + $0x50] sm:$0xff] }
  0x61   :  { %1284 = vmatprep.mubr.msk.f32.mxu1 %vm213_vm0, %v203_v34  ;;  %v1484_v58 = vpack.c.bf16 %v447_v57, %v446_v56  ;;  %v1488_v61 = vpack.c.bf16 %v449_v60, %v448_v59  ;;  %v451_v63 = vld [vmem:[%s2120_s3 + $0x58] sm:$0xff]  ;;  %v452_v1 = vld [vmem:[%s2120_s3 + $0x60] sm:$0xff]  ;;  %v453_v2 = vld [vmem:[%s2120_s3 + $0x68] sm:$0xff] }
  0x62   :  { %1447 = vmatpush3.bf16.msra.mxu0 %v1444_v16  ;;  %v1492_v0 = vpack.c.bf16 %v451_v63, %v450_v62  ;;  %v1496_v3 = vpack.c.bf16 %v453_v2, %v452_v1  ;;  %v454_v4 = vld [vmem:[%s2120_s3 + $0x70] sm:$0xff]  ;;  %v455_v5 = vld [vmem:[%s2120_s3 + $0x78] sm:$0xff]  ;;  %v866_v7 = vld [vmem:[#allocation9] sm:$0xff] }
  0x63   :  { %1449 = vmatprep.subr.bf16.mxu0 %v1448_v19  ;;  %v1500_v6 = vpack.c.bf16 %v455_v5, %v454_v4  ;;  %v867_v8 = vld [vmem:[#allocation9 + $0x8] sm:$0xff]  ;;  %v868_v10 = vld [vmem:[#allocation9 + $0x10] sm:$0xff]  ;;  %v869_v11 = vld [vmem:[#allocation9 + $0x18] sm:$0xff] }
  0x64   :  { %424 = vperm.xlu0 %1600, %v410_v39   ;;  %v1544_v9 = vpack.c.bf16 %v867_v8, %v866_v7  ;;  %v870_v14 = vld [vmem:[#allocation9 + $0x20] sm:$0xff]  ;;  %v871_v15 = vld [vmem:[#allocation9 + $0x28] sm:$0xff]  ;;  %v872_v17 = vld [vmem:[#allocation9 + $0x30] sm:$0xff] }
  0x65   :  { %v1552_v16 = vpack.c.bf16 %v871_v15, %v870_v14  ;;  %v873_v18 = vld [vmem:[#allocation9 + $0x38] sm:$0xff]  ;;  %v874_v20 = vld [vmem:[#allocation9 + $0x40] sm:$0xff]  ;;  %v875_v21 = vld [vmem:[#allocation9 + $0x48] sm:$0xff] }
  0x66   :  { %1451 = vmatpush3.bf16.msra.mxu0 %v1448_v19  ;;  %v1556_v19 = vpack.c.bf16 %v873_v18, %v872_v17  ;;  %v876_v23 = vld [vmem:[#allocation9 + $0x50] sm:$0xff]  ;;  %v877_v24 = vld [vmem:[#allocation9 + $0x58] sm:$0xff]  ;;  %v878_v26 = vld [vmem:[#allocation9 + $0x60] sm:$0xff] }
  0x67   :  { %1453 = vmatprep.subr.bf16.mxu0 %v1452_v22  ;;  %v535_v31 = vld [vmem:[%s2125_s8] sm:$0xff]  ;;  %v536_v32 = vld [vmem:[%s2125_s8 + $0x8] sm:$0xff]  ;;  %v537_v33 = vld [vmem:[%s2125_s8 + $0x10] sm:$0xff] }
  0x68   :  { %429 = vperm.xlu0 %1600, %v411_v40   ;;  %v538_v34 = vld [vmem:[%s2125_s8 + $0x18] sm:$0xff]  ;;  %v531_v35 = vld [vmem:[%s2124_s7] sm:$0xff]  ;;  %v734_v36 = vld [vmem:[%s2126_s9 + $0x8] sm:$0xff] }
  0x69   :  { %744 = vperm.xlu1 %1601, %v734_v36   ;;  %v973_v37 = vld [vmem:[%s2130_s13] sm:$0xff]  ;;  %v735_v38 = vld [vmem:[%s2126_s9 + $0x10] sm:$0xff]  ;;  %v736_v40 = vld [vmem:[%s2126_s9 + $0x18] sm:$0xff] }
  0x6a   :  { %1455 = vmatpush3.bf16.msra.mxu0 %v1452_v22  ;;  %v1560_v22 = vpack.c.bf16 %v875_v21, %v874_v20  ;;  %v1069_v39 = vld [vmem:[%s2131_s14] sm:$0xff]  ;;  %v974_v41 = vld [vmem:[%s2130_s13 + $0x8] sm:$0xff]  ;;  %v534_v1 = vld [vmem:[%s2124_s7 + $0x18] sm:$0xff] }
  0x6b   :  { %1457 = vmatprep.subr.bf16.mxu0 %v1456_v25  ;;  %v1070_v42 = vld [vmem:[%s2131_s14 + $0x8] sm:$0xff]  ;;  %v765_v2 = vld [vmem:[#allocation8] sm:$0xff]  ;;  %v767_v4 = vld [vmem:[#allocation8 + $0x10] sm:$0xff] }
  0x6c   :  { %977 = vperm.xlu0 %1600, %v973_v37   ;;  %v532_v63 = vld [vmem:[%s2124_s7 + $0x8] sm:$0xff]  ;;  %v769_v8 = vld [vmem:[#allocation8 + $0x20] sm:$0xff]  ;;  %v775_v18 = vld [vmem:[#allocation8 + $0x50] sm:$0xff] }
  0x6d   :  { %749 = vperm.xlu1 %1601, %v735_v38   ;;  %v773_v15 = vld [vmem:[#allocation8 + $0x40] sm:$0xff] }
  0x6e   :  { %1459 = vmatpush3.bf16.msra.mxu0 %v1456_v25  ;;  %v1564_v25 = vpack.c.bf16 %v877_v24, %v876_v23  ;;  %v777_v21 = vld [vmem:[#allocation8 + $0x60] sm:$0xff]  ;;  %v779_v24 = vld [vmem:[#allocation8 + $0x70] sm:$0xff] }
  0x6f   :  { %1461 = vmatprep.subr.bf16.mxu0 %v1460_v28 }
  0x70   :  { %1073 = vperm.xlu0 %1600, %v1069_v39  }
  0x71   :  { %754 = vperm.xlu1 %1601, %v736_v40  }
  0x72   :  { %1463 = vmatpush3.bf16.msra.mxu0 %v1460_v28  ;;  %v880_v28 = vld [vmem:[#allocation9 + $0x70] sm:$0xff] }
  0x73   :  { %1505 = vmatprep.subr.bf16.mxu0 %v1504_v30 }
  0x75   :  { %1268 = vmatmul.mubr.f32.vlgmr.msra.gmra.mrb[0].mxu0 %v111_v29  ;;  %v881_v29 = vld [vmem:[#allocation9 + $0x78] sm:$0xff]  ;;  %982 = vperm.xlu1 %1601, %v974_v41  }
  0x76   :  { %1507 = vmatpush3.bf16.msra.mxu0 %v1504_v30  ;;  %v1572_v30 = vpack.c.bf16 %v881_v29, %v880_v28  ;;  %1329 = vmatprep.mubr.msk.f32.mxu0 %vm213_vm0, %v535_v31 }
  0x79   :  { %1330 = vmatmul.mubr.msk.f32.vlgmr.msra.gmra.mrb[2].mxu0 %vm213_vm0, %v536_v32  ;;  %1078 = vperm.xlu1 %1601, %v1070_v42  }
  0x7a   :  { %1332 = vmatprep.mubr.msk.f32.mxu0 %vm213_vm0, %v537_v33 }
  0x7d   :  { %1333 = vmatmul.mubr.msk.f32.gmra.mrb[4].mxu0 %vm213_vm0, %v538_v34 }
  0x7e   :  { %1339 = vmatprep.mubr.msk.f32.mxu0 %vm213_vm0, %v531_v35 }
 0x148   :  { %v1269_v43 = vpop.f32.mrb[0].mxu0 }
 0x149   :  { %v194_v44 = vpop.f32.mrb[1].mxu0 }
 0x14a   :  { %v1468_v45 = vpack.c.bf16 %v1269_v43, %v194_v44  ;;  %v415_v43 = vpop.permute.xlu0 %414 }
 0x14c   :  { %1469 = vmatprep.subr.bf16.mxu1 %v1468_v45 }
 0x14d   :  { %1471 = vmatpush3.bf16.msra.mxu1 %v1468_v45 }
 0x14e   :  { %1473 = vmatprep.subr.bf16.mxu1 %v1472_v46  ;;  %v2079_v44 = vpop.permute.xlu0 %739 }
 0x150   :  { %1285 = vmatmul.mubr.msk.f32.vlgmr.msra.gmra.mrb[0].mxu1 %vm213_vm0, %v204_v49 }
 0x151   :  { %1475 = vmatpush3.bf16.msra.mxu1 %v1472_v46  ;;  %1287 = vmatprep.mubr.msk.f32.mxu1 %vm213_vm0, %v205_v50  ;;  %v420_v46 = vpop.permute.xlu1 %419 }
 0x152   :  { %1477 = vmatprep.subr.bf16.mxu1 %v1476_v51  ;;  %v425_v45 = vpop.permute.xlu0 %424 }
 0x154   :  { %1288 = vmatmul.mubr.msk.f32.gmra.mrb[2].mxu1 %vm213_vm0, %v206_v54 }
 0x155   :  { %1479 = vmatpush3.bf16.msra.mxu1 %v1476_v51  ;;  %1322 = vmatprep.mubr.f32.mxu1 %v1911_v12  ;;  %v1548_v12 = vpack.c.bf16 %v869_v11, %v868_v10  ;;  %v771_v11 = vld [vmem:[#allocation8 + $0x30] sm:$0xff] }
 0x156   :  { %1481 = vmatprep.subr.bf16.mxu1 %v1480_v55  ;;  %v430_v51 = vpop.permute.xlu0 %429 }
 0x159   :  { %1483 = vmatpush3.bf16.msra.mxu1 %v1480_v55 }
 0x15a   :  { %1485 = vmatprep.subr.bf16.mxu1 %v1484_v58 }
 0x15d   :  { %1487 = vmatpush3.bf16.msra.mxu1 %v1484_v58 }
 0x15e   :  { %1489 = vmatprep.subr.bf16.mxu1 %v1488_v61 }
 0x161   :  { %1491 = vmatpush3.bf16.msra.mxu1 %v1488_v61 }
 0x162   :  { %1493 = vmatprep.subr.bf16.mxu1 %v1492_v0 }
 0x165   :  { %1495 = vmatpush3.bf16.msra.mxu1 %v1492_v0  ;;  %v533_v0 = vld [vmem:[%s2124_s7 + $0x10] sm:$0xff] }
 0x166   :  { %1497 = vmatprep.subr.bf16.mxu1 %v1496_v3 }
 0x169   :  { %1499 = vmatpush3.bf16.msra.mxu1 %v1496_v3  ;;  %v766_v3 = vld [vmem:[#allocation8 + $0x8] sm:$0xff] }
 0x16a   :  { %1501 = vmatprep.subr.bf16.mxu1 %v1500_v6  ;;  %v1512_v5 = vpack.c.bf16 %v766_v3, %v765_v2 }
 0x16d   :  { %1503 = vmatpush3.bf16.msra.mxu1 %v1500_v6  ;;  %v768_v6 = vld [vmem:[#allocation8 + $0x18] sm:$0xff] }
 0x16e   :  { %1545 = vmatprep.subr.bf16.mxu1 %v1544_v9  ;;  %v1516_v7 = vpack.c.bf16 %v768_v6, %v767_v4 }
 0x170   :  { %1323 = vmatmul.mubr.f32.vlgmr.msra.gmra.mrb[4].mxu1 %v1913_v13  ;;  %v879_v13 = vld [vmem:[#allocation9 + $0x68] sm:$0xff] }
 0x171   :  { %1547 = vmatpush3.bf16.msra.mxu1 %v1544_v9  ;;  %v1568_v27 = vpack.c.bf16 %v879_v13, %v878_v26  ;;  %v770_v9 = vld [vmem:[#allocation8 + $0x28] sm:$0xff] }
 0x172   :  { %1549 = vmatprep.subr.bf16.mxu1 %v1548_v12  ;;  %v1520_v10 = vpack.c.bf16 %v770_v9, %v769_v8 }
 0x175   :  { %1551 = vmatpush3.bf16.msra.mxu1 %v1548_v12  ;;  %v772_v12 = vld [vmem:[#allocation8 + $0x38] sm:$0xff] }
 0x176   :  { %1553 = vmatprep.subr.bf16.mxu1 %v1552_v16  ;;  %v1524_v14 = vpack.c.bf16 %v772_v12, %v771_v11  ;;  %v1091_v11 = vstv %s2132_s15 }
 0x179   :  { %1555 = vmatpush3.bf16.msra.mxu1 %v1552_v16  ;;  %v774_v16 = vld [vmem:[#allocation8 + $0x48] sm:$0xff] }
 0x17a   :  { %1557 = vmatprep.subr.bf16.mxu1 %v1556_v19  ;;  %v1528_v17 = vpack.c.bf16 %v774_v16, %v773_v15 }
 0x17d   :  { %1559 = vmatpush3.bf16.msra.mxu1 %v1556_v19  ;;  %v776_v19 = vld [vmem:[#allocation8 + $0x58] sm:$0xff] }
 0x17e   :  { %1561 = vmatprep.subr.bf16.mxu1 %v1560_v22  ;;  %v1532_v20 = vpack.c.bf16 %v776_v19, %v775_v18 }
 0x181   :  { %1563 = vmatpush3.bf16.msra.mxu1 %v1560_v22  ;;  %v778_v22 = vld [vmem:[#allocation8 + $0x68] sm:$0xff] }
 0x182   :  { %1565 = vmatprep.subr.bf16.mxu1 %v1564_v25  ;;  %v1536_v23 = vpack.c.bf16 %v778_v22, %v777_v21 }
 0x185   :  { %1567 = vmatpush3.bf16.msra.mxu1 %v1564_v25  ;;  %v780_v25 = vld [vmem:[#allocation8 + $0x78] sm:$0xff] }
 0x186   :  { %1569 = vmatprep.subr.bf16.mxu1 %v1568_v27  ;;  %v1540_v26 = vpack.c.bf16 %v780_v25, %v779_v24 }
 0x189   :  { %1571 = vmatpush3.bf16.msra.mxu1 %v1568_v27 }
 0x18a   :  { %1573 = vmatprep.subr.bf16.mxu1 %v1572_v30 }
 0x18d   :  { %1575 = vmatpush3.bf16.msra.mxu1 %v1572_v30  ;;  %v745_v30 = vpop.permute.xlu1 %744 }
 0x191   :  { %v750_v31 = vpop.permute.xlu1 %749 }
 0x195   :  { %v755_v36 = vpop.permute.xlu1 %754 }
 0x223   :  { %v1286_v47 = vpop.f32.mrb[0].mxu1 }
 0x224   :  { %v433_v48 = vadd.f32 %v1286_v47, %v420_v46  ;;  %v389_v49 = vpop.f32.mrb[1].mxu1  ;;  %v971_v46 = vld [vmem:[%s2129_s12] sm:$0xff] }
 0x225   :  { %v432_v50 = vadd.f32 %v415_v43, %v389_v49 }
 0x226   :  { %v437_v54 = vmax.f32 %v433_v48, 0.0 }
 0x227   :  { %v436_v52 = vmax.f32 %v432_v50, 0.0  ;;  %v1289_v53 = vpop.f32.mrb[2].mxu1 }
 0x228   :  { %v435_v55 = vadd.f32 %v1289_v53, %v430_v51  ;;  %v399_v56 = vpop.f32.mrb[3].mxu1 }
 0x229   :  { %v434_v57 = vadd.f32 %v425_v45, %v399_v56  ;;  %1415 = vmatprep.mubr.f32.mxu1 %v436_v52  ;;  %v972_v56 = vld [vmem:[%s2129_s12 + $0x8] sm:$0xff] }
 0x22a   :  { %1416 = vmatmul.mubr.f32.vlgmr.msra.gmra.mrb[6].mxu1 %v437_v54  ;;  %v439_v59 = vmax.f32 %v435_v55, 0.0 }
 0x22b   :  { %v438_v58 = vmax.f32 %v434_v57, 0.0  ;;  %v983_v57 = vpop.permute.xlu1 %982 }
 0x22d   :  { %1418 = vmatprep.mubr.f32.mxu1 %v438_v58  ;;  %v978_v58 = vpop.permute.xlu0 %977 }
 0x22e   :  { %1419 = vmatmul.mubr.f32.gmra.mrb[8].mxu1 %v439_v59 }
 0x231   :  { %v1074_v2 = vpop.permute.xlu0 %1073 }
 0x243   :  { %v1324_v60 = vpop.f32.mrb[4].mxu1 }
 0x244   :  { %v522_v61 = vpop.f32.mrb[5].mxu1 }
 0x245   :  { %v1508_v62 = vpack.c.bf16 %v1324_v60, %v522_v61 }
 0x247   :  { %1509 = vmatprep.subr.bf16.mxu0 %v1508_v62 }
 0x248   :  { %1511 = vmatpush3.bf16.msra.mxu0 %v1508_v62 }
 0x249   :  { %1513 = vmatprep.subr.bf16.mxu0 %v1512_v5 }
 0x24b   :  { %1340 = vmatmul.mubr.msk.f32.vlgmr.msra.gmra.mrb[2].mxu0 %vm213_vm0, %v532_v63 }
 0x24c   :  { %1342 = vmatprep.mubr.msk.f32.mxu0 %vm213_vm0, %v533_v0  ;;  %1515 = vmatpush3.bf16.msra.mxu0 %v1512_v5  ;;  %v1079_v0 = vpop.permute.xlu1 %1078 }
 0x24d   :  { %1517 = vmatprep.subr.bf16.mxu0 %v1516_v7 }
 0x24f   :  { %1343 = vmatmul.mubr.msk.f32.gmra.mrb[4].mxu0 %vm213_vm0, %v534_v1 }
 0x250   :  { %1519 = vmatpush3.bf16.msra.mxu0 %v1516_v7 }
 0x251   :  { %1521 = vmatprep.subr.bf16.mxu0 %v1520_v10 }
 0x254   :  { %1523 = vmatpush3.bf16.msra.mxu0 %v1520_v10 }
 0x255   :  { %1525 = vmatprep.subr.bf16.mxu0 %v1524_v14 }
 0x258   :  { %1527 = vmatpush3.bf16.msra.mxu0 %v1524_v14 }
 0x259   :  { %1529 = vmatprep.subr.bf16.mxu0 %v1528_v17 }
 0x25c   :  { %1531 = vmatpush3.bf16.msra.mxu0 %v1528_v17 }
 0x25d   :  { %1533 = vmatprep.subr.bf16.mxu0 %v1532_v20 }
 0x260   :  { %1535 = vmatpush3.bf16.msra.mxu0 %v1532_v20 }
 0x261   :  { %1537 = vmatprep.subr.bf16.mxu0 %v1536_v23 }
 0x264   :  { %1539 = vmatpush3.bf16.msra.mxu0 %v1536_v23 }
 0x265   :  { %1541 = vmatprep.subr.bf16.mxu0 %v1540_v26 }
 0x268   :  { %1543 = vmatpush3.bf16.msra.mxu0 %v1540_v26 }
 0x2fd   :  { %v1417_v13 = vpop.f32.mrb[6].mxu1 }
 0x2fe   :  { %v948_v27 = vpop.f32.mrb[7].mxu1 }
 0x301   :  { %v1420_v28 = vpop.f32.mrb[8].mxu1 }
 0x302   :  { %v958_v29 = vpop.f32.mrb[9].mxu1 }
 0x31e   :  { %v1341_v32 = vpop.f32.mrb[2].mxu0 }
 0x31f   :  { %v758_v33 = vadd.f32 %v1341_v32, %v745_v30  ;;  %v714_v34 = vpop.f32.mrb[3].mxu0 }
 0x320   :  { %v757_v35 = vadd.f32 %v2079_v44, %v714_v34 }
 0x321   :  { %v762_v39 = vmax.f32 %v758_v33, 0.0 }
 0x322   :  { %v761_v37 = vmax.f32 %v757_v35, 0.0  ;;  %v1344_v38 = vpop.f32.mrb[4].mxu0 }
 0x323   :  { %v760_v40 = vadd.f32 %v1344_v38, %v755_v36  ;;  %v724_v41 = vpop.f32.mrb[5].mxu0 }
 0x324   :  { %v759_v42 = vadd.f32 %v750_v31, %v724_v41  ;;  %1377 = vmatprep.mubr.f32.mxu0 %v761_v37 }
 0x325   :  { %1378 = vmatmul.mubr.f32.vlgmr.msra.gmra.mrb[6].mxu0 %v762_v39  ;;  %v764_v45 = vmax.f32 %v760_v40, 0.0 }
 0x326   :  { %v763_v43 = vmax.f32 %v759_v42, 0.0 }
 0x328   :  { %1380 = vmatprep.mubr.f32.mxu0 %v763_v43 }
 0x329   :  { %1381 = vmatmul.mubr.f32.gmra.mrb[8].mxu0 %v764_v45 }
 0x32a   :  { %1429 = vmatprep.mubr.msk.f32.mxu0 %vm985_vm1, %v971_v46 }
 0x3f8   :  { %v1379_v44 = vpop.f32.mrb[6].mxu0 }
 0x3f9   :  { %v968_v47 = vsub.f32 %v1379_v44, %v1417_v13  ;;  %v847_v48 = vpop.f32.mrb[7].mxu0 }
 0x3fa   :  { %v967_v49 = vsub.f32 %v847_v48, %v948_v27 }
 0x3fc   :  { %v1576_v50 = vpack.c.bf16 %v968_v47, %v967_v49  ;;  %v1382_v51 = vpop.f32.mrb[8].mxu0 }
 0x3fd   :  { %v970_v52 = vsub.f32 %v1382_v51, %v1420_v28  ;;  %v857_v53 = vpop.f32.mrb[9].mxu0 }
 0x3fe   :  { %v969_v54 = vsub.f32 %v857_v53, %v958_v29  ;;  %1577 = vmatprep.subr.bf16.mxu0 %v1576_v50 }
 0x3ff   :  { %1579 = vmatpush3.bf16.msra.mxu0 %v1576_v50 }
 0x400   :  { %v1580_v55 = vpack.c.bf16 %v970_v52, %v969_v54 }
 0x402   :  { %1581 = vmatprep.subr.bf16.mxu0 %v1580_v55 }
 0x403   :  { %1583 = vmatpush3.bf16.msra.mxu0 %v1580_v55 }
 0x406   :  { %1430 = vmatmul.mubr.msk.f32.vlgmr.msra.gmra.mrb[10].mxu0 %vm985_vm1, %v972_v56 }
 0x4d9   :  { %v1431_v59 = vpop.f32.mrb[10].mxu0 }
 0x4da   :  { %v1064_v60 = vadd.f32 %v1431_v59, %v983_v57  ;;  %v1058_v61 = vpop.f32.mrb[11].mxu0 }
 0x4db   :  { %v1059_v62 = vadd.f32 %v1058_v61, %v978_v58 }
 0x4dc   :  { %v1068_v63 = vmax.f32 %v1064_v60, 0.0 }
 0x4dd   :  { %v1067_v1 = vmax.f32 %v1059_v62, 0.0 }
 0x4de   :  { %v1082_v3 = vmul.f32 %v1079_v0, %v1068_v63 }
 0x4df   :  { %v1081_v4 = vmul.f32 %v1074_v2, %v1067_v1 }
 0x4e1   :  { %v1083_v5 = vadd.f32 %v1082_v3, %v1081_v4 }
 0x4e3   :  { %v1084_v6 = vrot.slane %v1083_v5, 4 }
 0x4e5   :  { %v1085_v7 = vadd.f32 %v1084_v6, %v1083_v5 }
 0x4e7   :  { %v1086_v8 = vrot.slane %v1085_v7, 2 }
 0x4e9   :  { %v1087_v9 = vadd.f32 %v1086_v8, %v1085_v7 }
 0x4eb   :  { %v1088_v10 = vrot.slane %v1087_v9, 1 }
 0x4ed   :  { %v1089_v12 = vadd.f32 %v1088_v10, %v1087_v9 }
 0x4ef   :  { %v1092_v14 = vadd.f32 %v1091_v11, %v1089_v12 }
 0x4f1   :  { %1093 = vst [vmem:[#allocation11] sm:$0x1] %v1092_v14 }
 0x4f2   :  { %1701 = shalt.err (!%p1698_p8)
}
 0x4f3   :  { %s2139_s29 = sld [smem:[#allocation17_spill]] }
 0x4f9   :  { %s1702_s30 = scalar_lea.hbm %s2139_s29, 16 }
 0x4fa   :  { %p1703_p9 = scmp.ne.s32.totalorder %s2139_s29, %s1702_s30  ;;  %p1706_p10 = scmp.lt.u32.totalorder %s1702_s30, %s2139_s29 }
 0x4fc   :  { %p1708_p11 = pnand %p1706_p10, %p1703_p9 }
 0x4fe   :  { %1711 = shalt.err (!%p1708_p11)
}
 0x4ff   :  { %1103 = dma.vmem_to_hbm [thread:$0]  %s1101_s16, 16, %s2139_s29, [#allocation5]  }
 0x500   :  { %1718 = dma.done.wait [#allocation5], 16  }
 0x501   :  { %1719 = vsyncadd [#allocation5], 4294967280 }
 0x502   :  { %1107 = vsyncpa [#allocation4], 1 }
 0x503   :  { %1108 = vsyncpa [#allocation7], 1 }
 0x504   :  { %1109 = vsyncpa [#allocation10], 1 }
 0x505   :  { %1110 = vsyncpa [#allocation5], 1 }

</bundles_post_ra>
